<compile_context>
chip_gen: v7x
topology: tpu7x:2x2x1
jax: 0.10.0
libtpu: 0.0.40
codegen_flags: <defaults>
</compile_context>

<pallas_src>
import functools

import jax
import jax.numpy as jnp
from jax.experimental import pallas as pl
from jax.experimental.pallas import tpu as pltpu

HIDDEN = 32          # "BATCH_SIZE" in the original script is really the hidden width
IN_FEATURES = 46
EPS = 1e-5

TILE_ROWS = 8192           # row tile for the streamed passes (multiple of 128)
FAST_PATH_MAX_ROWS = 4096  # whole batch kept VMEM-resident below this row count
VMEM_LIMIT = 48 * 1024 * 1024


def _round_up(x, m):
    return (x + m - 1) // m * m


def _const2(i):
    return (0, 0)


# ----------------------------------------------------------------------------
# Shared trunk: relu(linear_k(.)) for k = 1..depth, applying the folded BN
# affines (scale/shift) of layers 1..depth-1.
# ----------------------------------------------------------------------------
def _trunk(x, ws, bs, scales, shifts, depth):
    h = x
    for j in range(depth):
        if j > 0:
            h = h * scales[j - 1] + shifts[j - 1]
        h = jnp.dot(h, ws[j], preferred_element_type=jnp.float32) + bs[j]
        h = jnp.maximum(h, 0.0)
    return h


# ----------------------------------------------------------------------------
# Fast path: single fused kernel, whole batch resident in VMEM.
# ----------------------------------------------------------------------------
def _bn_exact(h, gamma, beta):
    mean = jnp.mean(h, axis=0, keepdims=True)
    c = h - mean
    var = jnp.mean(c * c, axis=0, keepdims=True)      # biased variance (training BN)
    return gamma * c * jax.lax.rsqrt(var + EPS) + beta


def _fused_kernel(x_ref, w1, b1, w2, b2, w3, b3,
                  g1, be1, g2, be2, g3, be3, wo, bo, o_ref):
    h = jnp.maximum(jnp.dot(x_ref[...], w1[...],
                            preferred_element_type=jnp.float32) + b1[...], 0.0)
    h = _bn_exact(h, g1[...], be1[...])
    h = jnp.maximum(jnp.dot(h, w2[...],
                            preferred_element_type=jnp.float32) + b2[...], 0.0)
    h = _bn_exact(h, g2[...], be2[...])
    h = jnp.maximum(jnp.dot(h, w3[...],
                            preferred_element_type=jnp.float32) + b3[...], 0.0)
    h = _bn_exact(h, g3[...], be3[...])
    # TODO(synk): nn.Dropout(p=0.1) treated as identity (eval-mode semantics).
    o_ref[...] = jax.lax.dot_general(
        wo[...], h, (((1,), (1,)), ((), ())),
        preferred_element_type=jnp.float32) + bo[...]


def _fused_forward(x, p):
    n = x.shape[0]
    out = pl.pallas_call(
        _fused_kernel,
        out_shape=jax.ShapeDtypeStruct((1, n), jnp.float32),
        compiler_params=pltpu.CompilerParams(vmem_limit_bytes=VMEM_LIMIT),
    )(x, p["w1"], p["b1"], p["w2"], p["b2"], p["w3"], p["b3"],
      p["g1"], p["be1"], p["g2"], p["be2"], p["g3"], p["be3"],
      p["wo"], p["bo"])
    return out[0, :].reshape(n, 1)


# ----------------------------------------------------------------------------
# Tiled path: three row-tiled stats passes + one row-tiled final pass.
# ----------------------------------------------------------------------------
def _make_stats_kernel(depth, n_rows, tile_rows, num_tiles):
    """Per-tile [sum; M2-about-tile-mean] of h_depth; ragged last tile masked."""
    ragged = (n_rows % tile_rows) != 0

    def kernel(*refs):
        x_ref = refs[0]
        ws = [refs[1 + 2 * j][...] for j in range(depth)]
        bs = [refs[2 + 2 * j][...] for j in range(depth)]
        off = 1 + 2 * depth
        scales = [refs[off + 2 * j][...] for j in range(depth - 1)]
        shifts = [refs[off + 2 * j + 1][...] for j in range(depth - 1)]
        out_ref = refs[off + 2 * (depth - 1)]            # (2, HIDDEN) block

        h = _trunk(x_ref[...], ws, bs, scales, shifts, depth)

        def emit_full():
            s = jnp.sum(h, axis=0, keepdims=True)
            c = h - s * (1.0 / tile_rows)
            out_ref[0:1, :] = s
            out_ref[1:2, :] = jnp.sum(c * c, axis=0, keepdims=True)

        if not ragged:
            emit_full()
        else:
            last = pl.program_id(0) == num_tiles - 1

            @pl.when(jnp.logical_not(last))
            def _():
                emit_full()

            @pl.when(last)
            def _():
                # Rows >= n_rows come from an out-of-bounds (garbage) block read
                # and must not pollute the BN statistics.
                valid = n_rows - (num_tiles - 1) * tile_rows   # static
                row = jax.lax.broadcasted_iota(jnp.int32, (tile_rows, 1), 0)
                mask = row < valid
                hm = jnp.where(mask, h, 0.0)
                s = jnp.sum(hm, axis=0, keepdims=True)
                c = jnp.where(mask, hm - s * (1.0 / valid), 0.0)
                out_ref[0:1, :] = s
                out_ref[1:2, :] = jnp.sum(c * c, axis=0, keepdims=True)

    return kernel


def _final_kernel(x_ref, w1, b1, w2, b2, w3, b3,
                  s1, t1, s2, t2, s3, t3, wo, bo, o_ref):
    ws = [w1[...], w2[...], w3[...]]
    bs = [b1[...], b2[...], b3[...]]
    scales = [s1[...], s2[...]]
    shifts = [t1[...], t2[...]]
    h = _trunk(x_ref[...], ws, bs, scales, shifts, 3)
    h = h * s3[...] + t3[...]                      # batchnorm3 (folded affine)
    # TODO(synk): nn.Dropout(p=0.1) treated as identity (eval-mode semantics).
    # layer_out as (1,32).(tile,32)^T contraction -> lane-dense (1, tile) row.
    o_ref[...] = jax.lax.dot_general(
        wo[...], h, (((1,), (1,)), ((), ())),
        preferred_element_type=jnp.float32) + bo[...]


def _stats_pass(x, layer_params, affines, depth, n, tile, num_tiles):
    inputs = [x]
    in_specs = [pl.BlockSpec((tile, IN_FEATURES), lambda i: (i, 0))]
    for w, b in layer_params:
        inputs += [w, b]
        in_specs += [pl.BlockSpec(w.shape, _const2), pl.BlockSpec(b.shape, _const2)]
    for s, t in affines:
        inputs += [s, t]
        in_specs += [pl.BlockSpec(s.shape, _const2), pl.BlockSpec(t.shape, _const2)]

    return pl.pallas_call(
        _make_stats_kernel(depth, n, tile, num_tiles),
        out_shape=jax.ShapeDtypeStruct((num_tiles, 2, HIDDEN), jnp.float32),
        grid=(num_tiles,),
        in_specs=in_specs,
        out_specs=pl.BlockSpec((None, 2, HIDDEN), lambda i: (i, 0, 0)),
        compiler_params=pltpu.CompilerParams(
            dimension_semantics=("parallel",), vmem_limit_bytes=VMEM_LIMIT),
    )(*inputs)


def _combine_stats(partials, n, tile, num_tiles):
    """Chan-style combine of per-tile (sum, M2) partials -> (mean, biased var)."""
    sums = partials[:, 0, :]                          # (T, H)
    m2s = partials[:, 1, :]                           # (T, H)
    counts = [tile] * (num_tiles - 1) + [n - (num_tiles - 1) * tile]
    counts = jnp.asarray(counts, jnp.float32).reshape(num_tiles, 1)
    mean = jnp.sum(sums, axis=0, keepdims=True) / n
    mean_i = sums / counts
    m2 = (jnp.sum(m2s, axis=0, keepdims=True)
          + jnp.sum(counts * (mean_i - mean) ** 2, axis=0, keepdims=True))
    var = m2 / n
    return mean, var


def _bn_affine(mean, var, gamma, beta):
    scale = gamma * jax.lax.rsqrt(var + EPS)
    shift = beta - mean * scale
    return scale, shift


def _final_pass(x, p, affines, n, tile, num_tiles):
    (s1, t1), (s2, t2), (s3, t3) = affines
    inputs = [x, p["w1"], p["b1"], p["w2"], p["b2"], p["w3"], p["b3"],
              s1, t1, s2, t2, s3, t3, p["wo"], p["bo"]]
    in_specs = [pl.BlockSpec((tile, IN_FEATURES), lambda i: (i, 0))]
    in_specs += [pl.BlockSpec(a.shape, _const2) for a in inputs[1:]]

    out = pl.pallas_call(
        _final_kernel,
        out_shape=jax.ShapeDtypeStruct((1, n), jnp.float32),
        grid=(num_tiles,),
        in_specs=in_specs,
        out_specs=pl.BlockSpec((1, tile), lambda i: (0, i)),
        compiler_params=pltpu.CompilerParams(
            dimension_semantics=("parallel",), vmem_limit_bytes=VMEM_LIMIT),
    )(*inputs)
    return out[0, :].reshape(n, 1)


def _tiled_forward(x, p):
    n = x.shape[0]
    # Cap tile so there are >= 2 tiles (v7x megacore sharding); tiles are 128-row
    # aligned so the (1, tile) output blocks stay lane-dense.
    tile = min(TILE_ROWS, _round_up(pl.cdiv(n, 2), 128))
    num_tiles = pl.cdiv(n, tile)

    layers = [(p["w1"], p["b1"]), (p["w2"], p["b2"]), (p["w3"], p["b3"])]
    gammas = [p["g1"], p["g2"], p["g3"]]
    betas = [p["be1"], p["be2"], p["be3"]]

    affines = []
    for d in (1, 2, 3):
        partials = _stats_pass(x, layers[:d], affines, d, n, tile, num_tiles)
        mean, var = _combine_stats(partials, n, tile, num_tiles)
        affines.append(_bn_affine(mean, var, gammas[d - 1], betas[d - 1]))

    return _final_pass(x, p, affines, n, tile, num_tiles)


# ----------------------------------------------------------------------------
# Public forward
# ----------------------------------------------------------------------------
@functools.partial(jax.jit, static_argnums=(2,))
def _forward(x, params, fast_max_rows):
    x = x.astype(jnp.float32)
    n = x.shape[0]
    if n <= fast_max_rows:
        return _fused_forward(x, params)
    return _tiled_forward(x, params)


def binary_classification_forward(x, params, fast_max_rows=FAST_PATH_MAX_ROWS):
    """x: [N, 46] float32 -> logits [N, 1] float32 (training-mode BN, dropout=identity)."""
    return _forward(x, params, fast_max_rows)


# ----------------------------------------------------------------------------
# Parameters & pure-JAX reference
# ----------------------------------------------------------------------------
def init_params(key):
    """Deterministic synthetic parameters matching the PyTorch module's shapes.

    Hidden Linear weights are stored pre-transposed as [in, out]; layer_out's
    weight is kept in PyTorch's [1, 32] row layout for the lane-dense output.
    """
    ks = jax.random.split(key, 8)

    def linear(kw, kb, fan_in, fan_out, w_shape):
        bound = 1.0 / jnp.sqrt(fan_in)
        w = jax.random.uniform(kw, w_shape, jnp.float32, -bound, bound)
        b = jax.random.uniform(kb, (1, fan_out), jnp.float32, -bound, bound)
        return w, b

    w1, b1 = linear(ks[0], ks[1], IN_FEATURES, HIDDEN, (IN_FEATURES, HIDDEN))
    w2, b2 = linear(ks[2], ks[3], HIDDEN, HIDDEN, (HIDDEN, HIDDEN))
    w3, b3 = linear(ks[4], ks[5], HIDDEN, HIDDEN, (HIDDEN, HIDDEN))
    wo, bo = linear(ks[6], ks[7], HIDDEN, 1, (1, HIDDEN))   # wo: (1, 32), bo: (1, 1)

    ones = jnp.ones((1, HIDDEN), jnp.float32)
    zeros = jnp.zeros((1, HIDDEN), jnp.float32)
    return dict(
        w1=w1, b1=b1, g1=ones, be1=zeros,
        w2=w2, b2=b2, g2=ones, be2=zeros,
        w3=w3, b3=b3, g3=ones, be3=zeros,
        wo=wo, bo=bo,
    )


def _bn_train_ref(h, gamma, beta):
    mean = jnp.mean(h, axis=0, keepdims=True)
    var = jnp.mean((h - mean) ** 2, axis=0, keepdims=True)   # biased variance
    return gamma * (h - mean) * jax.lax.rsqrt(var + EPS) + beta


def reference_forward(x, p):
    """Pure-JAX reference (same math, no Pallas)."""
    h = jnp.maximum(x @ p["w1"] + p["b1"], 0.0)
    h = _bn_train_ref(h, p["g1"], p["be1"])
    h = jnp.maximum(h @ p["w2"] + p["b2"], 0.0)
    h = _bn_train_ref(h, p["g2"], p["be2"])
    h = jnp.maximum(h @ p["w3"] + p["b3"], 0.0)
    h = _bn_train_ref(h, p["g3"], p["be3"])
    return h @ p["wo"].T + p["bo"]


if __name__ == "__main__":
    key = jax.random.PRNGKey(0)
    k_x, k_p = jax.random.split(key)
    params = init_params(k_p)

    # Small batch -> single fused VMEM-resident kernel (fast path).
    n_small = 8
    x_small = jax.random.normal(k_x, (n_small, IN_FEATURES), jnp.float32)
    out_small = jax.block_until_ready(binary_classification_forward(x_small, params))
    ref_small = reference_forward(x_small, params)
    assert out_small.shape == (n_small, 1), out_small.shape
    assert jnp.allclose(out_small, ref_small, atol=5e-4, rtol=5e-4), (out_small, ref_small)

    # Force the row-tiled multi-pass path (2 tiles, ragged last tile) at a small size.
    n_tiled = 300
    x_tiled = jax.random.normal(k_x, (n_tiled, IN_FEATURES), jnp.float32)
    out_tiled = jax.block_until_ready(
        binary_classification_forward(x_tiled, params, fast_max_rows=0))
    ref_tiled = reference_forward(x_tiled, params)
    assert out_tiled.shape == (n_tiled, 1), out_tiled.shape
    assert jnp.allclose(out_tiled, ref_tiled, atol=5e-4, rtol=5e-4), (out_tiled, ref_tiled)

    print("KERNEL_OK")
</pallas_src>

<mosaic_0001>
module attributes {stable_mosaic.version = 11 : i64} {
  func.func @_fused_kernel(%arg0: memref<8x46xf32, #tpu.memory_space<vmem>>, %arg1: memref<46x32xf32, #tpu.memory_space<vmem>>, %arg2: memref<1x32xf32, #tpu.memory_space<vmem>>, %arg3: memref<32x32xf32, #tpu.memory_space<vmem>>, %arg4: memref<1x32xf32, #tpu.memory_space<vmem>>, %arg5: memref<32x32xf32, #tpu.memory_space<vmem>>, %arg6: memref<1x32xf32, #tpu.memory_space<vmem>>, %arg7: memref<1x32xf32, #tpu.memory_space<vmem>>, %arg8: memref<1x32xf32, #tpu.memory_space<vmem>>, %arg9: memref<1x32xf32, #tpu.memory_space<vmem>>, %arg10: memref<1x32xf32, #tpu.memory_space<vmem>>, %arg11: memref<1x32xf32, #tpu.memory_space<vmem>>, %arg12: memref<1x32xf32, #tpu.memory_space<vmem>>, %arg13: memref<1x32xf32, #tpu.memory_space<vmem>>, %arg14: memref<1x1xf32, #tpu.memory_space<vmem>>, %arg15: memref<1x8xf32, #tpu.memory_space<vmem>>) attributes {dimension_semantics = [], scalar_prefetch = 0 : i64, scratch_operands = 0 : i64, tpu.core_type = #tpu.core_type<tc>} {
    %c0 = arith.constant 0 : index
    %c0_0 = arith.constant 0 : index
    %0 = vector.load %arg0[%c0, %c0_0] : memref<8x46xf32, #tpu.memory_space<vmem>>, vector<8x46xf32>
    %c0_1 = arith.constant 0 : index
    %c0_2 = arith.constant 0 : index
    %1 = vector.load %arg1[%c0_1, %c0_2] : memref<46x32xf32, #tpu.memory_space<vmem>>, vector<46x32xf32>
    %cst = arith.constant dense<0.000000e+00> : vector<8x32xf32>
    %2 = tpu.matmul %0, %1, %cst {dimension_numbers = #tpu.dot_dimension_numbers<[1], [0], [0], [1], [0, 0, 1, 1], [], []>} : vector<8x46xf32>, vector<46x32xf32>, vector<8x32xf32> -> vector<8x32xf32>
    %c0_3 = arith.constant 0 : index
    %c0_4 = arith.constant 0 : index
    %3 = vector.load %arg2[%c0_3, %c0_4] : memref<1x32xf32, #tpu.memory_space<vmem>>, vector<1x32xf32>
    %4 = vector.broadcast %3 : vector<1x32xf32> to vector<8x32xf32>
    %5 = arith.addf %2, %4 : vector<8x32xf32>
    %cst_5 = arith.constant 0.000000e+00 : f32
    %6 = vector.broadcast %cst_5 : f32 to vector<8x32xf32>
    %7 = arith.maximumf %5, %6 : vector<8x32xf32>
    %c0_6 = arith.constant 0 : index
    %c0_7 = arith.constant 0 : index
    %8 = vector.load %arg7[%c0_6, %c0_7] : memref<1x32xf32, #tpu.memory_space<vmem>>, vector<1x32xf32>
    %c0_8 = arith.constant 0 : index
    %c0_9 = arith.constant 0 : index
    %9 = vector.load %arg8[%c0_8, %c0_9] : memref<1x32xf32, #tpu.memory_space<vmem>>, vector<1x32xf32>
    %cst_10 = arith.constant dense<0.000000e+00> : vector<32xf32>
    %10 = vector.multi_reduction <add>, %7, %cst_10 [0] : vector<8x32xf32> to vector<32xf32>
    %11 = vector.shape_cast %10 : vector<32xf32> to vector<1x32xf32>
    %cst_11 = arith.constant 8.000000e+00 : f32
    %12 = vector.broadcast %cst_11 : f32 to vector<1x32xf32>
    %13 = arith.divf %11, %12 : vector<1x32xf32>
    %14 = vector.broadcast %13 : vector<1x32xf32> to vector<8x32xf32>
    %15 = arith.subf %7, %14 : vector<8x32xf32>
    %16 = arith.mulf %15, %15 : vector<8x32xf32>
    %cst_12 = arith.constant dense<0.000000e+00> : vector<32xf32>
    %17 = vector.multi_reduction <add>, %16, %cst_12 [0] : vector<8x32xf32> to vector<32xf32>
    %18 = vector.shape_cast %17 : vector<32xf32> to vector<1x32xf32>
    %cst_13 = arith.constant 8.000000e+00 : f32
    %19 = vector.broadcast %cst_13 : f32 to vector<1x32xf32>
    %20 = arith.divf %18, %19 : vector<1x32xf32>
    %21 = vector.broadcast %8 : vector<1x32xf32> to vector<8x32xf32>
    %22 = arith.mulf %21, %15 : vector<8x32xf32>
    %cst_14 = arith.constant 9.99999974E-6 : f32
    %23 = vector.broadcast %cst_14 : f32 to vector<1x32xf32>
    %24 = arith.addf %20, %23 : vector<1x32xf32>
    %25 = math.rsqrt %24 : vector<1x32xf32>
    %26 = vector.broadcast %25 : vector<1x32xf32> to vector<8x32xf32>
    %27 = arith.mulf %22, %26 : vector<8x32xf32>
    %28 = vector.broadcast %9 : vector<1x32xf32> to vector<8x32xf32>
    %29 = arith.addf %27, %28 : vector<8x32xf32>
    %c0_15 = arith.constant 0 : index
    %c0_16 = arith.constant 0 : index
    %30 = vector.load %arg3[%c0_15, %c0_16] : memref<32x32xf32, #tpu.memory_space<vmem>>, vector<32x32xf32>
    %cst_17 = arith.constant dense<0.000000e+00> : vector<8x32xf32>
    %31 = tpu.matmul %29, %30, %cst_17 {dimension_numbers = #tpu.dot_dimension_numbers<[1], [0], [0], [1], [0, 0, 1, 1], [], []>} : vector<8x32xf32>, vector<32x32xf32>, vector<8x32xf32> -> vector<8x32xf32>
    %c0_18 = arith.constant 0 : index
    %c0_19 = arith.constant 0 : index
    %32 = vector.load %arg4[%c0_18, %c0_19] : memref<1x32xf32, #tpu.memory_space<vmem>>, vector<1x32xf32>
    %33 = vector.broadcast %32 : vector<1x32xf32> to vector<8x32xf32>
    %34 = arith.addf %31, %33 : vector<8x32xf32>
    %cst_20 = arith.constant 0.000000e+00 : f32
    %35 = vector.broadcast %cst_20 : f32 to vector<8x32xf32>
    %36 = arith.maximumf %34, %35 : vector<8x32xf32>
    %c0_21 = arith.constant 0 : index
    %c0_22 = arith.constant 0 : index
    %37 = vector.load %arg9[%c0_21, %c0_22] : memref<1x32xf32, #tpu.memory_space<vmem>>, vector<1x32xf32>
    %c0_23 = arith.constant 0 : index
    %c0_24 = arith.constant 0 : index
    %38 = vector.load %arg10[%c0_23, %c0_24] : memref<1x32xf32, #tpu.memory_space<vmem>>, vector<1x32xf32>
    %cst_25 = arith.constant dense<0.000000e+00> : vector<32xf32>
    %39 = vector.multi_reduction <add>, %36, %cst_25 [0] : vector<8x32xf32> to vector<32xf32>
    %40 = vector.shape_cast %39 : vector<32xf32> to vector<1x32xf32>
    %cst_26 = arith.constant 8.000000e+00 : f32
    %41 = vector.broadcast %cst_26 : f32 to vector<1x32xf32>
    %42 = arith.divf %40, %41 : vector<1x32xf32>
    %43 = vector.broadcast %42 : vector<1x32xf32> to vector<8x32xf32>
    %44 = arith.subf %36, %43 : vector<8x32xf32>
    %45 = arith.mulf %44, %44 : vector<8x32xf32>
    %cst_27 = arith.constant dense<0.000000e+00> : vector<32xf32>
    %46 = vector.multi_reduction <add>, %45, %cst_27 [0] : vector<8x32xf32> to vector<32xf32>
    %47 = vector.shape_cast %46 : vector<32xf32> to vector<1x32xf32>
    %cst_28 = arith.constant 8.000000e+00 : f32
    %48 = vector.broadcast %cst_28 : f32 to vector<1x32xf32>
    %49 = arith.divf %47, %48 : vector<1x32xf32>
    %50 = vector.broadcast %37 : vector<1x32xf32> to vector<8x32xf32>
    %51 = arith.mulf %50, %44 : vector<8x32xf32>
    %cst_29 = arith.constant 9.99999974E-6 : f32
    %52 = vector.broadcast %cst_29 : f32 to vector<1x32xf32>
    %53 = arith.addf %49, %52 : vector<1x32xf32>
    %54 = math.rsqrt %53 : vector<1x32xf32>
    %55 = vector.broadcast %54 : vector<1x32xf32> to vector<8x32xf32>
    %56 = arith.mulf %51, %55 : vector<8x32xf32>
    %57 = vector.broadcast %38 : vector<1x32xf32> to vector<8x32xf32>
    %58 = arith.addf %56, %57 : vector<8x32xf32>
    %c0_30 = arith.constant 0 : index
    %c0_31 = arith.constant 0 : index
    %59 = vector.load %arg5[%c0_30, %c0_31] : memref<32x32xf32, #tpu.memory_space<vmem>>, vector<32x32xf32>
    %cst_32 = arith.constant dense<0.000000e+00> : vector<8x32xf32>
    %60 = tpu.matmul %58, %59, %cst_32 {dimension_numbers = #tpu.dot_dimension_numbers<[1], [0], [0], [1], [0, 0, 1, 1], [], []>} : vector<8x32xf32>, vector<32x32xf32>, vector<8x32xf32> -> vector<8x32xf32>
    %c0_33 = arith.constant 0 : index
    %c0_34 = arith.constant 0 : index
    %61 = vector.load %arg6[%c0_33, %c0_34] : memref<1x32xf32, #tpu.memory_space<vmem>>, vector<1x32xf32>
    %62 = vector.broadcast %61 : vector<1x32xf32> to vector<8x32xf32>
    %63 = arith.addf %60, %62 : vector<8x32xf32>
    %cst_35 = arith.constant 0.000000e+00 : f32
    %64 = vector.broadcast %cst_35 : f32 to vector<8x32xf32>
    %65 = arith.maximumf %63, %64 : vector<8x32xf32>
    %c0_36 = arith.constant 0 : index
    %c0_37 = arith.constant 0 : index
    %66 = vector.load %arg11[%c0_36, %c0_37] : memref<1x32xf32, #tpu.memory_space<vmem>>, vector<1x32xf32>
    %c0_38 = arith.constant 0 : index
    %c0_39 = arith.constant 0 : index
    %67 = vector.load %arg12[%c0_38, %c0_39] : memref<1x32xf32, #tpu.memory_space<vmem>>, vector<1x32xf32>
    %cst_40 = arith.constant dense<0.000000e+00> : vector<32xf32>
    %68 = vector.multi_reduction <add>, %65, %cst_40 [0] : vector<8x32xf32> to vector<32xf32>
    %69 = vector.shape_cast %68 : vector<32xf32> to vector<1x32xf32>
    %cst_41 = arith.constant 8.000000e+00 : f32
    %70 = vector.broadcast %cst_41 : f32 to vector<1x32xf32>
    %71 = arith.divf %69, %70 : vector<1x32xf32>
    %72 = vector.broadcast %71 : vector<1x32xf32> to vector<8x32xf32>
    %73 = arith.subf %65, %72 : vector<8x32xf32>
    %74 = arith.mulf %73, %73 : vector<8x32xf32>
    %cst_42 = arith.constant dense<0.000000e+00> : vector<32xf32>
    %75 = vector.multi_reduction <add>, %74, %cst_42 [0] : vector<8x32xf32> to vector<32xf32>
    %76 = vector.shape_cast %75 : vector<32xf32> to vector<1x32xf32>
    %cst_43 = arith.constant 8.000000e+00 : f32
    %77 = vector.broadcast %cst_43 : f32 to vector<1x32xf32>
    %78 = arith.divf %76, %77 : vector<1x32xf32>
    %79 = vector.broadcast %66 : vector<1x32xf32> to vector<8x32xf32>
    %80 = arith.mulf %79, %73 : vector<8x32xf32>
    %cst_44 = arith.constant 9.99999974E-6 : f32
    %81 = vector.broadcast %cst_44 : f32 to vector<1x32xf32>
    %82 = arith.addf %78, %81 : vector<1x32xf32>
    %83 = math.rsqrt %82 : vector<1x32xf32>
    %84 = vector.broadcast %83 : vector<1x32xf32> to vector<8x32xf32>
    %85 = arith.mulf %80, %84 : vector<8x32xf32>
    %86 = vector.broadcast %67 : vector<1x32xf32> to vector<8x32xf32>
    %87 = arith.addf %85, %86 : vector<8x32xf32>
    %c0_45 = arith.constant 0 : index
    %c0_46 = arith.constant 0 : index
    %88 = vector.load %arg13[%c0_45, %c0_46] : memref<1x32xf32, #tpu.memory_space<vmem>>, vector<1x32xf32>
    %cst_47 = arith.constant dense<0.000000e+00> : vector<1x8xf32>
    %89 = tpu.matmul %88, %87, %cst_47 {dimension_numbers = #tpu.dot_dimension_numbers<[1], [1], [0], [0], [0, 0, 1, 0], [], []>} : vector<1x32xf32>, vector<8x32xf32>, vector<1x8xf32> -> vector<1x8xf32>
    %c0_48 = arith.constant 0 : index
    %c0_49 = arith.constant 0 : index
    %90 = vector.load %arg14[%c0_48, %c0_49] : memref<1x1xf32, #tpu.memory_space<vmem>>, vector<1x1xf32>
    %91 = vector.broadcast %90 : vector<1x1xf32> to vector<1x8xf32>
    %92 = arith.addf %89, %91 : vector<1x8xf32>
    %c0_50 = arith.constant 0 : index
    %c0_51 = arith.constant 0 : index
    %93 = vector.load %arg15[%c0_50, %c0_51] : memref<1x8xf32, #tpu.memory_space<vmem>>, vector<1x8xf32>
    tpu.vector_store %arg15[%c0_50, %c0_51], %92 {strides = array<i32>} : memref<1x8xf32, #tpu.memory_space<vmem>>, vector<1x8xf32>,
    return
  }
}

</mosaic_0001>

<bundles_post_ra>
// kernel: _forward.1
= control target key start
LH: loop header
LB: loop body
LE: loop exit
PB: predicated region body
PF: predicated region fallthrough
CT: control target
= control target key end

     0   :  { %s869_s0 = inlined_call_operand.vmem [shape: f32[8,46], index: 0, kind: input, shape index: {}]   ;;  %s870_s1 = inlined_call_operand.vmem [shape: f32[46,32], index: 1, kind: input, shape index: {}]   ;;  %s871_s2 = inlined_call_operand.vmem [shape: f32[1,32], index: 2, kind: input, shape index: {}]   ;;  %s872_s3 = inlined_call_operand.vmem [shape: f32[32,32], index: 3, kind: input, shape index: {}]   ;;  %s873_s4 = inlined_call_operand.vmem [shape: f32[1,32], index: 4, kind: input, shape index: {}]   ;;  %s874_s5 = inlined_call_operand.vmem [shape: f32[32,32], index: 5, kind: input, shape index: {}]   ;;  %s875_s6 = inlined_call_operand.vmem [shape: f32[1,32], index: 6, kind: input, shape index: {}]   ;;  %s876_s7 = inlined_call_operand.vmem [shape: f32[1,32], index: 7, kind: input, shape index: {}]   ;;  %s877_s8 = inlined_call_operand.vmem [shape: f32[1,32], index: 8, kind: input, shape index: {}]   ;;  %s878_s9 = inlined_call_operand.vmem [shape: f32[1,32], index: 9, kind: input, shape index: {}]   ;;  %s879_s10 = inlined_call_operand.vmem [shape: f32[1,32], index: 10, kind: input, shape index: {}]   ;;  %s880_s11 = inlined_call_operand.vmem [shape: f32[1,32], index: 11, kind: input, shape index: {}]   ;;  %s881_s12 = inlined_call_operand.vmem [shape: f32[1,32], index: 12, kind: input, shape index: {}]   ;;  %s882_s13 = inlined_call_operand.vmem [shape: f32[1,32], index: 13, kind: input, shape index: {}]   ;;  %s883_s14 = inlined_call_operand.<no memory space> [shape: f32[1,1], index: 14, kind: input, shape index: {}]   ;;  %s884_s15 = inlined_call_operand.hbm [shape: f32[1,8], index: 15, kind: output, shape index: {}]  }
   0x1   :  { %v20_v0 = vstv %s883_s14 }
   0x2   :  { %21 = vst [vmem:[#allocation2] sm:$0x1] %v20_v0 }
   0x3   :  { %v54_v1 = vld [vmem:[%s870_s1] sm:$0xff]  ;;  %v55_v2 = vld [vmem:[%s870_s1 + $0x8] sm:$0xff]  ;;  %v56_v3 = vld [vmem:[%s870_s1 + $0x10] sm:$0xff]  ;;  %v667_v4 = vmov 0.0|0.0   ;;  %vm668_vm0 = vmmov 0   ;;  %v669_v7 = vmov 0.0  }
   0x4   :  { %608 = vmatprep.subr.bf16.mxu0 %v667_v4  ;;  %v609_v5 = vpack.c.bf16 %v55_v2, %v54_v1  ;;  %v57_v6 = vld [vmem:[%s870_s1 + $0x18] sm:$0xff]  ;;  %618 = vmatprep.subr.bf16.mxu1 %v667_v4 }
   0x5   :  { %578 = vmatprep.mubr.msk.f32.mxu0 %vm668_vm0, %v669_v7  ;;  %589 = vmatprep.mubr.msk.f32.mxu1 %vm668_vm0, %v669_v7  ;;  %v612_v8 = vpack.c.bf16 %v57_v6, %v56_v3 }
   0x6   :  { %610 = vmatpush3.bf16.msra.mxu0 %v609_v5 }
   0x7   :  { %22 = vsyncpa [#allocation4], 0  ;;  %611 = vmatprep.subr.bf16.mxu0 %v667_v4  ;;  %v58_v9 = vld [vmem:[%s870_s1 + $0x20] sm:$0xff]  ;;  %v59_v10 = vld [vmem:[%s870_s1 + $0x28] sm:$0x3f]  ;;  %vm71_vm1 = vcmask 1045504  }
   0x8   :  { %v615_v11 = vpack.c.bf16 %v59_v10, %v58_v9  ;;  %vm670_vm2 = vmmov 1   ;;  %v53_v12 = vld [vmem:[%s869_s0] sm:$0xff]  ;;  %vm67_vm4 = vcmask 375808   ;;  %v186_v14 = vld [vmem:[%s872_s3 + $0x8] sm:$0xff]  ;;  %v187_v16 = vld [vmem:[%s872_s3 + $0x10] sm:$0xff]  ;;  %vm148_vm5 = vcmask 261120  }
   0x9   :  { %vm616_vm3 = vmpackc.low %vm71_vm1, %vm670_vm2  ;;  %v185_v13 = vld [vmem:[%s872_s3] sm:$0xff]  ;;  %v188_v17 = vld [vmem:[%s872_s3 + $0x18] sm:$0xff]  ;;  %vm516_vm6 = vcmask 57344  }
   0xa   :  { %613 = vmatpush3.bf16.msra.mxu0 %v612_v8  ;;  %v619_v15 = vpack.c.bf16 %v186_v14, %v185_v13  ;;  %v622_v18 = vpack.c.bf16 %v188_v17, %v187_v16  ;;  %v532_v19 = vld [vmem:[%s871_s2] ss:$0 sm:$0xff]  ;;  %v308_v50 = vld [vmem:[%s874_s5 + $0x8] sm:$0xff]  ;;  %v309_v52 = vld [vmem:[%s874_s5 + $0x10] sm:$0xff] }
   0xb   :  { %614 = vmatprep.subr.bf16.mxu0 %v667_v4  ;;  %v535_v43 = vld [vmem:[%s876_s7] ss:$0 sm:$0xff]  ;;  %v310_v53 = vld [vmem:[%s874_s5 + $0x18] sm:$0xff] }
   0xc   :  { %620 = vmatpush3.bf16.msra.mxu1 %v619_v15  ;;  %v536_v46 = vld [vmem:[%s877_s8] ss:$0 sm:$0xff]  ;;  %v628_v54 = vpack.c.bf16 %v310_v53, %v309_v52 }
   0xd   :  { %621 = vmatprep.subr.bf16.mxu1 %v667_v4  ;;  %v307_v49 = vld [vmem:[%s874_s5] sm:$0xff] }
   0xe   :  { %617 = vmatpush3.bf16.msk.msra.mxu0 %vm616_vm3, %v615_v11  ;;  %v625_v51 = vpack.c.bf16 %v308_v50, %v307_v49  ;;  %v537_v55 = vld [vmem:[%s873_s4] ss:$0 sm:$0xff] }
   0xf   :  { %603 = vmatprep.subr.mxu0 %v669_v7  ;;  %v539_v15 = vld [vmem:[%s878_s9] ss:$0 sm:$0xff] }
  0x10   :  { %623 = vmatpush3.bf16.msra.mxu1 %v622_v18  ;;  %v540_v18 = vld [vmem:[%s879_s10] ss:$0 sm:$0xff] }
  0x11   :  { %579 = vmatmul.mubr.msk.f32.vlgmr.msra.gmra.mrb[0].mxu0 %vm67_vm4, %v53_v12  ;;  %624 = vmatprep.subr.bf16.mxu1 %v667_v4  ;;  %v544_v50 = vld [vmem:[%s881_s12] ss:$0 sm:$0xff] }
  0x12   :  { %605 = vmatprep.mubr.msk.f32.mxu0 %vm668_vm0, %v669_v7  ;;  %v429_v53 = vld [vmem:[%s882_s13] sm:$0x1] }
  0xe4   :  { %v141_v20 = vpop.f32.mrb[0].mxu0 }
  0xe5   :  { %v142_v21 = vadd.f32 %v532_v19, %v141_v20  ;;  %v580_v22 = vpop.f32.mrb[1].mxu0 }
  0xe6   :  { %v671_v22 = vmov 0  }
  0xe7   :  { %v145_v23 = vmax.f32 %v142_v21, 0.0  ;;  %v430_v21 = vld [vmem:[#allocation2] sm:$0x1]  ;;  %636 = vset.pattern.permute.xlu0 %v671_v22 }
  0xe8   :  { %433 = vperm.xlu0 %636, %v430_v21  }
  0xe9   :  { %v149_v24 = vsel %vm148_vm5, %v145_v23, 0.0 }
  0xea   :  { %v150_v25 = vrot.slane %v149_v24, 4 }
  0xec   :  { %v151_v26 = vadd.f32 %v150_v25, %v149_v24 }
  0xee   :  { %v152_v27 = vrot.slane %v151_v26, 2 }
  0xf0   :  { %v153_v28 = vadd.f32 %v152_v27, %v151_v26 }
  0xf2   :  { %v154_v29 = vrot.slane %v153_v28, 1 }
  0xf4   :  { %v155_v30 = vadd.f32 %v154_v29, %v153_v28 }
  0xf6   :  { %v157_v31 = vmul.f32 0.125, %v155_v30 }
  0xf8   :  { %v158_v32 = vsub.f32 %v145_v23, %v157_v31  ;;  %v541_v23 = vld [vmem:[%s875_s6] ss:$0 sm:$0xff] }
  0xfa   :  { %v159_v33 = vmul.f32 %v158_v32, %v158_v32  ;;  %v174_v44 = vmul.f32 %v535_v43, %v158_v32 }
  0xfc   :  { %v160_v34 = vsel %vm148_vm5, %v159_v33, 0.0 }
  0xfd   :  { %v161_v35 = vrot.slane %v160_v34, 4 }
  0xff   :  { %v162_v36 = vadd.f32 %v161_v35, %v160_v34 }
 0x101   :  { %v163_v37 = vrot.slane %v162_v36, 2 }
 0x103   :  { %v164_v38 = vadd.f32 %v163_v37, %v162_v36 }
 0x105   :  { %v165_v39 = vrot.slane %v164_v38, 1 }
 0x107   :  { %v166_v40 = vadd.f32 %v165_v39, %v164_v38 }
 0x109   :  { %v167_v41 = vmul.f32 0.125, %v166_v40 }
 0x10b   :  { %v175_v42 = vadd.f32 1e-05, %v167_v41 }
 0x10d   :  { %637 = vrsqrt.f32 %v175_v42 }
 0x117   :  { %v638_v45 = vpop.eup %637 }
 0x118   :  { %v177_v47 = vmul.f32 %v638_v45, %v174_v44 }
 0x11a   :  { %v184_v48 = vadd.f32 %v536_v46, %v177_v47  ;;  %v543_v47 = vld [vmem:[%s880_s11] ss:$0 sm:$0xff]  ;;  %s672_s11 = smov [#allocation3]  }
 0x11b   :  { %s524_s25 = sshll.u32 %s672_s11, 4  ;;  %s525_s25 = int_to_ptr.vmem [resolvable:$true] %s524_s25 }
 0x11c   :  { %590 = vmatmul.mubr.msk.f32.vlgmr.msra.gmra.mrb[0].mxu1 %vm148_vm5, %v184_v48  ;;  %s643_s12 = scalar_lea.vmem %s525_s25, 16  ;;  %s647_s2 = scalar_lea.vmem %s525_s25, 32 }
 0x11d   :  { %600 = vmatprep.mubr.msk.f32.mxu1 %vm668_vm0, %v669_v7  ;;  %626 = vmatpush3.bf16.msra.mxu1 %v625_v51  ;;  %p644_p0 = scmp.ne.s32.totalorder %s525_s25, %s643_s12  ;;  %p648_p1 = scmp.lt.s32.totalorder %s525_s25, %s525_s25 }
 0x11e   :  { %627 = vmatprep.subr.bf16.mxu1 %v667_v4  ;;  %p649_p2 = scmp.lt.s32.totalorder %s647_s2, %s643_s12 }
 0x120   :  { %p650_p3 = por %p649_p2, %p648_p1 }
 0x121   :  { %629 = vmatpush3.bf16.msra.mxu1 %v628_v54  ;;  %v436_v54 = vlaneseq }
 0x122   :  { %p651_p4 = pnand %p650_p3, %p644_p0 }
 0x1ef   :  { %v265_v56 = vpop.f32.mrb[0].mxu1 }
 0x1f0   :  { %v266_v57 = vadd.f32 %v537_v55, %v265_v56  ;;  %v591_v58 = vpop.f32.mrb[1].mxu1  ;;  %v437_v55 = vshrl.u32 %v436_v54, 7 }
 0x1f2   :  { %v269_v59 = vmax.f32 %v266_v57, 0.0  ;;  %v438_v56 = vsub.s32 0, %v437_v55  ;;  %v434_v57 = vpop.permute.xlu0 %433 }
 0x1f4   :  { %v272_v60 = vsel %vm148_vm5, %v269_v59, 0.0  ;;  %v439_v58 = vrot.slane %v434_v57, %v438_v56 }
 0x1f5   :  { %v273_v61 = vrot.slane %v272_v60, 4 }
 0x1f7   :  { %v274_v62 = vadd.f32 %v273_v61, %v272_v60 }
 0x1f9   :  { %v275_v63 = vrot.slane %v274_v62, 2 }
 0x1fb   :  { %v276_v0 = vadd.f32 %v275_v63, %v274_v62 }
 0x1fd   :  { %v277_v1 = vrot.slane %v276_v0, 1 }
 0x1ff   :  { %v278_v2 = vadd.f32 %v277_v1, %v276_v0 }
 0x201   :  { %v279_v3 = vmul.f32 0.125, %v278_v2 }
 0x203   :  { %v280_v4 = vsub.f32 %v269_v59, %v279_v3 }
 0x205   :  { %v281_v5 = vmul.f32 %v280_v4, %v280_v4  ;;  %v296_v16 = vmul.f32 %v539_v15, %v280_v4 }
 0x207   :  { %v282_v6 = vsel %vm148_vm5, %v281_v5, 0.0 }
 0x208   :  { %v283_v7 = vrot.slane %v282_v6, 4 }
 0x20a   :  { %v284_v8 = vadd.f32 %v283_v7, %v282_v6 }
 0x20c   :  { %v285_v9 = vrot.slane %v284_v8, 2 }
 0x20e   :  { %v286_v10 = vadd.f32 %v285_v9, %v284_v8 }
 0x210   :  { %v287_v11 = vrot.slane %v286_v10, 1 }
 0x212   :  { %v288_v12 = vadd.f32 %v287_v11, %v286_v10 }
 0x214   :  { %v289_v13 = vmul.f32 0.125, %v288_v12 }
 0x216   :  { %v297_v14 = vadd.f32 1e-05, %v289_v13 }
 0x218   :  { %639 = vrsqrt.f32 %v297_v14 }
 0x222   :  { %v640_v17 = vpop.eup %639 }
 0x223   :  { %v299_v19 = vmul.f32 %v640_v17, %v296_v16 }
 0x225   :  { %v306_v20 = vadd.f32 %v540_v18, %v299_v19 }
 0x227   :  { %601 = vmatmul.mubr.msk.f32.vlgmr.msra.gmra.mrb[2].mxu1 %vm148_vm5, %v306_v20 }
 0x2fa   :  { %v387_v24 = vpop.f32.mrb[2].mxu1 }
 0x2fb   :  { %v388_v25 = vadd.f32 %v541_v23, %v387_v24  ;;  %v602_v26 = vpop.f32.mrb[3].mxu1 }
 0x2fd   :  { %v391_v27 = vmax.f32 %v388_v25, 0.0 }
 0x2ff   :  { %v394_v28 = vsel %vm148_vm5, %v391_v27, 0.0 }
 0x300   :  { %v395_v29 = vrot.slane %v394_v28, 4 }
 0x302   :  { %v396_v30 = vadd.f32 %v395_v29, %v394_v28 }
 0x304   :  { %v397_v31 = vrot.slane %v396_v30, 2 }
 0x306   :  { %v398_v32 = vadd.f32 %v397_v31, %v396_v30 }
 0x308   :  { %v399_v33 = vrot.slane %v398_v32, 1 }
 0x30a   :  { %v400_v34 = vadd.f32 %v399_v33, %v398_v32 }
 0x30c   :  { %v401_v35 = vmul.f32 0.125, %v400_v34 }
 0x30e   :  { %v402_v36 = vsub.f32 %v391_v27, %v401_v35 }
 0x310   :  { %v403_v37 = vmul.f32 %v402_v36, %v402_v36  ;;  %v418_v48 = vmul.f32 %v543_v47, %v402_v36 }
 0x312   :  { %v404_v38 = vsel %vm148_vm5, %v403_v37, 0.0 }
 0x313   :  { %v405_v39 = vrot.slane %v404_v38, 4 }
 0x315   :  { %v406_v40 = vadd.f32 %v405_v39, %v404_v38 }
 0x317   :  { %v407_v41 = vrot.slane %v406_v40, 2 }
 0x319   :  { %v408_v42 = vadd.f32 %v407_v41, %v406_v40 }
 0x31b   :  { %v409_v43 = vrot.slane %v408_v42, 1 }
 0x31d   :  { %v410_v44 = vadd.f32 %v409_v43, %v408_v42 }
 0x31f   :  { %v411_v45 = vmul.f32 0.125, %v410_v44 }
 0x321   :  { %v419_v46 = vadd.f32 1e-05, %v411_v45 }
 0x323   :  { %641 = vrsqrt.f32 %v419_v46 }
 0x32d   :  { %v642_v49 = vpop.eup %641 }
 0x32e   :  { %v421_v51 = vmul.f32 %v642_v49, %v418_v48 }
 0x330   :  { %v428_v52 = vadd.f32 %v544_v50, %v421_v51 }
 0x332   :  { %604 = vmatpush3.xpose.msk.msra.mxu0 %vm148_vm5, %v428_v52 }
 0x335   :  { %606 = vmatmul.mubr.msk.f32.vlgmr.msra.gmra.mrb[2].mxu0 %vm148_vm5, %v429_v53 }
 0x408   :  { %v512_v59 = vpop.f32.mrb[2].mxu0 }
 0x409   :  { %v513_v60 = vadd.f32 %v512_v59, %v439_v58  ;;  %v607_v61 = vpop.f32.mrb[3].mxu0 }
 0x40b   :  { %517 = vst.msk [vmem:[#allocation3] sm:$0x1] %vm516_vm6, %v513_v60 }
 0x40c   :  { %654 = shalt.err (!%p651_p4)
}
 0x40d   :  { %s655_s26 = scalar_lea.hbm %s884_s15, 16 }
 0x40e   :  { %p656_p5 = scmp.ne.s32.totalorder %s884_s15, %s655_s26  ;;  %p659_p6 = scmp.lt.u32.totalorder %s655_s26, %s884_s15 }
 0x410   :  { %p661_p7 = pnand %p659_p6, %p656_p5 }
 0x412   :  { %664 = shalt.err (!%p661_p7)
}
 0x413   :  { %527 = dma.vmem_to_hbm [thread:$0]  %s525_s25, 16, %s884_s15, [#allocation4]  }
 0x414   :  { %665 = dma.done.wait [#allocation4], 16  }
 0x415   :  { %666 = vsyncadd [#allocation4], 4294967280 }
 0x416   :  { %531 = vsyncpa [#allocation4], 1 }

</bundles_post_ra>
